<compile_context>
chip_gen: v5e
topology: v5e:2x2
jax: 0.10.0
libtpu: 0.0.40
codegen_flags: <defaults>
</compile_context>

<pallas_src>
import functools

import jax
import jax.numpy as jnp
from jax.experimental import pallas as pl
from jax.experimental.pallas import tpu as pltpu

EPS = 1e-5
VMEM_LIMIT = 48 * 1024 * 1024     # safe on v7x (64 MiB physical), generous on v5e/v6e
MXU_DTYPE = jnp.float32           # set to jnp.bfloat16 on v6e/v7x for peak MXU rate


# --------------------------------------------------------------------------- #
# Kernels
# --------------------------------------------------------------------------- #
def conv_bn_stats_kernel(*refs, NB, H, W, C, K, fuse_bn_relu):
    """NB images per grid step, everything lane-dense with W*C on the lane axis.

    refs (fuse_bn_relu=True):  x, wstack, scale, shift, z_out, stats_out
    refs (fuse_bn_relu=False): x, wstack,               z_out, stats_out

    x:       (NB, H, WC)   conv1: raw input rows; conv2: pre-BN conv1 output rows
    wstack:  (K*WC, WC)    K banded tap matrices stacked along the contraction axis
                           (they encode the horizontal tap shift + horizontal zero pad)
    scale/shift: (1, WC)   previous BN folded to a per-channel FMA (conv2 only)
    z_out:   (NB, H, WC)   conv output (pre-BN, bias-free), lane-dense
    stats_out: (1, 2, WC)  per-step [sum, sum-of-squares], lane-dense
    """
    if fuse_bn_relu:
        x_ref, w_ref, scale_ref, shift_ref, z_ref, stats_ref = refs
    else:
        x_ref, w_ref, z_ref, stats_ref = refs

    P = (K - 1) // 2
    WC = W * C
    M = NB * H

    x = x_ref[...]
    if fuse_bn_relu:
        # Previous BN + ReLU as a single full-lane-width per-channel FMA.
        y = jnp.maximum(x * scale_ref[...] + shift_ref[...], 0.0)
    else:
        y = x

    # Vertical zero padding entirely in vregs (only 2*P halo rows of zeros).
    if P > 0:
        zrow = jnp.zeros((NB, P, WC), jnp.float32)
        ypad = jnp.concatenate([zrow, y, zrow], axis=1)        # (NB, H+2P, WC)
    else:
        ypad = y

    # im2row along the lane axis: fuse the K taps into one fat MXU contraction
    #   (NB*H, K*WC) @ (K*WC, WC)   with f32 accumulation.
    lhs = jnp.concatenate([ypad[:, dy:dy + H, :] for dy in range(K)],
                          axis=-1).reshape(M, K * WC)
    z = jnp.dot(lhs.astype(MXU_DTYPE), w_ref[...],
                preferred_element_type=jnp.float32)            # (M, WC)

    # Per-step partial BatchNorm statistics, lane-dense (global fold in wrapper).
    stats_ref[0, 0:1, :] = jnp.sum(z, axis=0, keepdims=True)
    stats_ref[0, 1:2, :] = jnp.sum(z * z, axis=0, keepdims=True)

    z_ref[...] = z.reshape(NB, H, WC)


def bn_residual_relu_kernel(z_ref, x_ref, scale_ref, shift_ref, out_ref):
    """out = relu(scale * z + shift + x); NB-image lane-dense blocks, out aliases z."""
    out_ref[...] = jnp.maximum(
        z_ref[...] * scale_ref[...] + shift_ref[...] + x_ref[...], 0.0)


# --------------------------------------------------------------------------- #
# Host-side helpers (weight repacking, tiny per-channel folds)
# --------------------------------------------------------------------------- #
def build_banded_weights(w_hwio, W):
    """(K, K, C, Co) HWIO conv weights -> (K*W*C, W*Co) stacked banded matrices.

    wb[dy, u*C+ci, w*Co+co] = w_hwio[dy, u-w+P, ci, co]  (0 if u-w+P not in [0,K)).
    Encodes the horizontal tap shift *and* the horizontal zero padding; the K tap
    matrices are stacked along the contraction axis for the fused single matmul.
    """
    K, _, C, Co = w_hwio.shape
    P = (K - 1) // 2
    dxs = jnp.arange(K)[:, None, None]
    us = jnp.arange(W)[None, :, None]
    ws = jnp.arange(W)[None, None, :]
    valid = (us == ws + dxs - P).astype(jnp.float32)                 # (K, W, W)
    wb = jnp.einsum("xuw,yxio->yuiwo", valid, w_hwio.astype(jnp.float32))
    return wb.reshape(K * W * C, W * Co).astype(MXU_DTYPE)


def bn_fold(stats, gamma, beta, count, W, C):
    """Per-step (sum, sumsq) over lanes -> global per-channel (scale, shift)."""
    tot = jnp.sum(stats.astype(jnp.float32), axis=0)          # (2, W*C)
    tot = tot.reshape(2, W, C).sum(axis=1)                    # (2, C)
    mean = tot[0] / count
    var = tot[1] / count - mean * mean                        # biased var (training BN)
    scale = gamma.astype(jnp.float32) * jax.lax.rsqrt(var + EPS)
    shift = beta.astype(jnp.float32) - scale * mean           # conv bias cancels exactly
    return scale, shift


def tile_lanes(v, W):
    """(C,) per-channel vector -> (1, W*C) lane-tiled row (channel fastest)."""
    return jnp.tile(v.astype(jnp.float32), W).reshape(1, -1)


def _pick_nb(N, H, WC, min_grid=4, target_bytes=1 << 20):
    """Largest divisor of N with block <= target_bytes while keeping >= min_grid grid
    steps (so v7x's two TensorCores each still get >= 2 pipelined steps)."""
    cap = max(1, target_bytes // (H * WC * 4))
    cap = min(cap, max(1, N // min_grid))
    nb = 1
    for d in range(1, N + 1):
        if N % d == 0 and d <= cap:
            nb = d
    return nb


# --------------------------------------------------------------------------- #
# pallas_call wrappers
# --------------------------------------------------------------------------- #
def _conv_call(x_lane, wstack, scale_t=None, shift_t=None, *, NB, H, W, C, K):
    N = x_lane.shape[0]
    WC = W * C
    G = N // NB
    fuse = scale_t is not None

    in_specs = [pl.BlockSpec((NB, H, WC), lambda n: (n, 0, 0)),
                pl.BlockSpec((K * WC, WC), lambda n: (0, 0))]
    args = [x_lane, wstack]
    if fuse:
        in_specs += [pl.BlockSpec((1, WC), lambda n: (0, 0)),
                     pl.BlockSpec((1, WC), lambda n: (0, 0))]
        args += [scale_t, shift_t]

    kern = functools.partial(conv_bn_stats_kernel, NB=NB, H=H, W=W, C=C, K=K,
                             fuse_bn_relu=fuse)
    return pl.pallas_call(
        kern,
        out_shape=(jax.ShapeDtypeStruct((N, H, WC), jnp.float32),
                   jax.ShapeDtypeStruct((G, 2, WC), jnp.float32)),
        grid_spec=pltpu.PrefetchScalarGridSpec(
            num_scalar_prefetch=0,
            grid=(G,),
            in_specs=in_specs,
            out_specs=[pl.BlockSpec((NB, H, WC), lambda n: (n, 0, 0)),
                       pl.BlockSpec((1, 2, WC), lambda n: (n, 0, 0))],
        ),
        compiler_params=pltpu.CompilerParams(
            dimension_semantics=("parallel",),
            vmem_limit_bytes=VMEM_LIMIT),
    )(*args)


def _finalize_call(z2, x_lane, scale_t, shift_t, *, NB, H, WC):
    N = z2.shape[0]
    G = N // NB
    return pl.pallas_call(
        bn_residual_relu_kernel,
        out_shape=jax.ShapeDtypeStruct((N, H, WC), jnp.float32),
        grid_spec=pltpu.PrefetchScalarGridSpec(
            num_scalar_prefetch=0,
            grid=(G,),
            in_specs=[pl.BlockSpec((NB, H, WC), lambda n: (n, 0, 0)),
                      pl.BlockSpec((NB, H, WC), lambda n: (n, 0, 0)),
                      pl.BlockSpec((1, WC), lambda n: (0, 0)),
                      pl.BlockSpec((1, WC), lambda n: (0, 0))],
            out_specs=pl.BlockSpec((NB, H, WC), lambda n: (n, 0, 0)),
        ),
        input_output_aliases={0: 0},      # output reuses z2's HBM buffer
        compiler_params=pltpu.CompilerParams(
            dimension_semantics=("parallel",),
            vmem_limit_bytes=VMEM_LIMIT),
    )(z2, x_lane, scale_t, shift_t)


def resblock_pallas(x_nchw, params, kernel_size):
    """Forward of ResBlock with training-mode BatchNorm. (N,C,H,W) f32 in/out."""
    w1, _b1, g1, be1, w2, _b2, g2, be2 = params    # conv biases cancel inside BN
    N, C, H, W = x_nchw.shape
    K = kernel_size
    WC = W * C
    count = N * H * W
    NB = _pick_nb(N, H, WC)

    # NCHW -> lane-dense (N, H, W*C): channel is fastest along the lane axis.
    x_lane = jnp.transpose(x_nchw, (0, 2, 3, 1)).reshape(N, H, WC).astype(jnp.float32)

    wb1 = build_banded_weights(w1, W)
    wb2 = build_banded_weights(w2, W)

    # conv1 + per-step BN1 partial statistics.
    z1, stats1 = _conv_call(x_lane, wb1, NB=NB, H=H, W=W, C=C, K=K)
    scale1, shift1 = bn_fold(stats1, g1, be1, count, W, C)

    # BN1 + ReLU fused into conv2's prologue, + per-step BN2 partial statistics.
    z2, stats2 = _conv_call(z1, wb2, tile_lanes(scale1, W), tile_lanes(shift1, W),
                            NB=NB, H=H, W=W, C=C, K=K)
    scale2, shift2 = bn_fold(stats2, g2, be2, count, W, C)

    # BN2 + residual + ReLU (lane-dense elementwise, aliases z2).
    out_lane = _finalize_call(z2, x_lane, tile_lanes(scale2, W), tile_lanes(shift2, W),
                              NB=NB, H=H, WC=WC)

    return jnp.transpose(out_lane.reshape(N, H, W, C), (0, 3, 1, 2))


# --------------------------------------------------------------------------- #
# Pure-JAX reference (mirrors the PyTorch forward, training-mode BN, with bias)
# --------------------------------------------------------------------------- #
def resblock_ref(x_nchw, params, kernel_size):
    w1, b1, g1, be1, w2, b2, g2, be2 = params
    P = (kernel_size - 1) // 2

    def conv(x, w_hwio, b):
        w_oihw = jnp.transpose(w_hwio, (3, 2, 0, 1))
        y = jax.lax.conv_general_dilated(
            x, w_oihw, window_strides=(1, 1), padding=((P, P), (P, P)),
            dimension_numbers=("NCHW", "OIHW", "NCHW"))
        return y + b[None, :, None, None]

    def bn(x, g, be):
        mean = jnp.mean(x, axis=(0, 2, 3), keepdims=True)
        var = jnp.mean((x - mean) ** 2, axis=(0, 2, 3), keepdims=True)
        return (x - mean) * jax.lax.rsqrt(var + EPS) * g[None, :, None, None] \
            + be[None, :, None, None]

    y = jax.nn.relu(bn(conv(x_nchw, w1, b1), g1, be1))
    y = bn(conv(y, w2, b2), g2, be2) + x_nchw
    return jax.nn.relu(y)


def init_params(key, nb_channels, kernel_size):
    C, K = nb_channels, kernel_size
    k1, k2, k3, k4, k5, k6, k7, k8 = jax.random.split(key, 8)
    scale = 1.0 / jnp.sqrt(C * K * K)
    w1 = (scale * jax.random.normal(k1, (K, K, C, C))).astype(jnp.float32)   # HWIO
    b1 = (scale * jax.random.normal(k2, (C,))).astype(jnp.float32)
    w2 = (scale * jax.random.normal(k3, (K, K, C, C))).astype(jnp.float32)
    b2 = (scale * jax.random.normal(k4, (C,))).astype(jnp.float32)
    g1 = (1.0 + 0.1 * jax.random.normal(k5, (C,))).astype(jnp.float32)
    be1 = (0.1 * jax.random.normal(k6, (C,))).astype(jnp.float32)
    g2 = (1.0 + 0.1 * jax.random.normal(k7, (C,))).astype(jnp.float32)
    be2 = (0.1 * jax.random.normal(k8, (C,))).astype(jnp.float32)
    return (w1, b1, g1, be1, w2, b2, g2, be2)


if __name__ == "__main__":
    # W*C = 128 -> exactly one vreg lane width; N=8 with NB=2 -> grid of 4
    # (>= 2 pipelined steps per TensorCore on v7x).
    N, C, H, W = 8, 8, 16, 16
    kernel_size = 3

    key = jax.random.PRNGKey(0)
    kx, kp = jax.random.split(key)
    x = jax.random.normal(kx, (N, C, H, W), dtype=jnp.float32)
    params = init_params(kp, C, kernel_size)

    fwd = jax.jit(resblock_pallas, static_argnums=(2,))
    out = jax.block_until_ready(fwd(x, params, kernel_size))
    ref = jax.block_until_ready(resblock_ref(x, params, kernel_size))

    assert out.shape == (N, C, H, W) and out.dtype == jnp.float32
    tol = 1e-4 if MXU_DTYPE == jnp.float32 else 2e-2
    err = float(jnp.max(jnp.abs(out - ref)))
    assert err < tol, f"max abs err {err}"
    print("KERNEL_OK")
</pallas_src>

<mosaic_0001>
module attributes {stable_mosaic.version = 11 : i64} {
  func.func @conv_bn_stats_kernel(%arg0: i32, %arg1: memref<2x16x128xf32, #tpu.memory_space<vmem>>, %arg2: memref<384x128xf32, #tpu.memory_space<vmem>>, %arg3: memref<2x16x128xf32, #tpu.memory_space<vmem>>, %arg4: memref<1x2x128xf32, #tpu.memory_space<vmem>>) attributes {dimension_semantics = [#tpu.dimension_semantics<parallel>], iteration_bounds = array<i64: 4>, scalar_prefetch = 0 : i64, scratch_operands = 0 : i64, tpu.core_type = #tpu.core_type<tc>, window_params = [{transform_indices = @transform_0, window_bounds = array<i64: 2, 16, 128>}, {pipeline_mode = #tpu.pipeline_mode<synchronous>, transform_indices = @transform_1, window_bounds = array<i64: 384, 128>}, {transform_indices = @transform_2, window_bounds = array<i64: 2, 16, 128>}, {transform_indices = @transform_3, window_bounds = array<i64: 1, 2, 128>}]} {
    %c0 = arith.constant 0 : index
    %c0_0 = arith.constant 0 : index
    %c0_1 = arith.constant 0 : index
    %0 = vector.load %arg1[%c0, %c0_0, %c0_1] : memref<2x16x128xf32, #tpu.memory_space<vmem>>, vector<2x16x128xf32>
    %cst = arith.constant 0.000000e+00 : f32
    %1 = vector.broadcast %cst : f32 to vector<2x1x128xf32>
    %2 = tpu.concatenate %1, %0, %1 in 1 : vector<2x1x128xf32>, vector<2x16x128xf32>, vector<2x1x128xf32> -> vector<2x18x128xf32>
    %3 = vector.extract_strided_slice %2 {offsets = [0, 0, 0], sizes = [2, 16, 128], strides = [1, 1, 1]} : vector<2x18x128xf32> to vector<2x16x128xf32>
    %4 = vector.extract_strided_slice %2 {offsets = [0, 1, 0], sizes = [2, 16, 128], strides = [1, 1, 1]} : vector<2x18x128xf32> to vector<2x16x128xf32>
    %5 = vector.extract_strided_slice %2 {offsets = [0, 2, 0], sizes = [2, 16, 128], strides = [1, 1, 1]} : vector<2x18x128xf32> to vector<2x16x128xf32>
    %6 = tpu.concatenate %3, %4, %5 in 2 : vector<2x16x128xf32>, vector<2x16x128xf32>, vector<2x16x128xf32> -> vector<2x16x384xf32>
    %7 = vector.shape_cast %6 : vector<2x16x384xf32> to vector<32x384xf32>
    %c0_2 = arith.constant 0 : index
    %c0_3 = arith.constant 0 : index
    %8 = vector.load %arg2[%c0_2, %c0_3] : memref<384x128xf32, #tpu.memory_space<vmem>>, vector<384x128xf32>
    %cst_4 = arith.constant dense<0.000000e+00> : vector<32x128xf32>
    %9 = tpu.matmul %7, %8, %cst_4 {dimension_numbers = #tpu.dot_dimension_numbers<[1], [0], [0], [1], [0, 0, 1, 1], [], []>} : vector<32x384xf32>, vector<384x128xf32>, vector<32x128xf32> -> vector<32x128xf32>
    %cst_5 = arith.constant dense<0.000000e+00> : vector<128xf32>
    %10 = vector.multi_reduction <add>, %9, %cst_5 [0] : vector<32x128xf32> to vector<128xf32>
    %11 = vector.shape_cast %10 : vector<128xf32> to vector<1x128xf32>
    %c0_6 = arith.constant 0 : index
    %c0_7 = arith.constant 0 : index
    %c0_8 = arith.constant 0 : index
    %12 = vector.load %arg4[%c0_6, %c0_7, %c0_8] : memref<1x2x128xf32, #tpu.memory_space<vmem>>, vector<1x1x128xf32>
    %13 = vector.shape_cast %12 : vector<1x1x128xf32> to vector<1x128xf32>
    %14 = vector.shape_cast %11 : vector<1x128xf32> to vector<1x1x128xf32>
    tpu.vector_store %arg4[%c0_6, %c0_7, %c0_8], %14 {strides = array<i32>} : memref<1x2x128xf32, #tpu.memory_space<vmem>>, vector<1x1x128xf32>,
    %15 = arith.mulf %9, %9 : vector<32x128xf32>
    %cst_9 = arith.constant dense<0.000000e+00> : vector<128xf32>
    %16 = vector.multi_reduction <add>, %15, %cst_9 [0] : vector<32x128xf32> to vector<128xf32>
    %17 = vector.shape_cast %16 : vector<128xf32> to vector<1x128xf32>
    %c0_10 = arith.constant 0 : index
    %c1 = arith.constant 1 : index
    %c0_11 = arith.constant 0 : index
    %18 = vector.load %arg4[%c0_10, %c1, %c0_11] : memref<1x2x128xf32, #tpu.memory_space<vmem>>, vector<1x1x128xf32>
    %19 = vector.shape_cast %18 : vector<1x1x128xf32> to vector<1x128xf32>
    %20 = vector.shape_cast %17 : vector<1x128xf32> to vector<1x1x128xf32>
    tpu.vector_store %arg4[%c0_10, %c1, %c0_11], %20 {strides = array<i32>} : memref<1x2x128xf32, #tpu.memory_space<vmem>>, vector<1x1x128xf32>,
    %21 = vector.shape_cast %9 : vector<32x128xf32> to vector<2x16x128xf32>
    %c0_12 = arith.constant 0 : index
    %c0_13 = arith.constant 0 : index
    %c0_14 = arith.constant 0 : index
    %22 = vector.load %arg3[%c0_12, %c0_13, %c0_14] : memref<2x16x128xf32, #tpu.memory_space<vmem>>, vector<2x16x128xf32>
    tpu.vector_store %arg3[%c0_12, %c0_13, %c0_14], %21 {strides = array<i32>} : memref<2x16x128xf32, #tpu.memory_space<vmem>>, vector<2x16x128xf32>,
    return
  }
  func.func @transform_0(%arg0: i32) -> (i32, i32, i32) {
    %c0_i32 = arith.constant 0 : i32
    %c0_i32_0 = arith.constant 0 : i32
    %c0_i32_1 = arith.constant 0 : i32
    return %arg0, %c0_i32, %c0_i32_0 : i32, i32, i32
  }
  func.func @transform_1(%arg0: i32) -> (i32, i32) {
    %c0_i32 = arith.constant 0 : i32
    %c0_i32_0 = arith.constant 0 : i32
    %c0_i32_1 = arith.constant 0 : i32
    return %c0_i32, %c0_i32_0 : i32, i32
  }
  func.func @transform_2(%arg0: i32) -> (i32, i32, i32) {
    %c0_i32 = arith.constant 0 : i32
    %c0_i32_0 = arith.constant 0 : i32
    %c0_i32_1 = arith.constant 0 : i32
    return %arg0, %c0_i32, %c0_i32_0 : i32, i32, i32
  }
  func.func @transform_3(%arg0: i32) -> (i32, i32, i32) {
    %c0_i32 = arith.constant 0 : i32
    %c0_i32_0 = arith.constant 0 : i32
    %c0_i32_1 = arith.constant 0 : i32
    return %arg0, %c0_i32, %c0_i32_0 : i32, i32, i32
  }
}

module attributes {stable_mosaic.version = 11 : i64} {
  func.func @bn_residual_relu_kernel(%arg0: i32, %arg1: memref<2x16x128xf32, #tpu.memory_space<vmem>>, %arg2: memref<2x16x128xf32, #tpu.memory_space<vmem>>, %arg3: memref<1x128xf32, #tpu.memory_space<vmem>>, %arg4: memref<1x128xf32, #tpu.memory_space<vmem>>, %arg5: memref<2x16x128xf32, #tpu.memory_space<vmem>>) attributes {dimension_semantics = [#tpu.dimension_semantics<parallel>], iteration_bounds = array<i64: 4>, scalar_prefetch = 0 : i64, scratch_operands = 0 : i64, tpu.core_type = #tpu.core_type<tc>, window_params = [{transform_indices = @transform_0, window_bounds = array<i64: 2, 16, 128>}, {transform_indices = @transform_1, window_bounds = array<i64: 2, 16, 128>}, {pipeline_mode = #tpu.pipeline_mode<synchronous>, transform_indices = @transform_2, window_bounds = array<i64: 1, 128>}, {pipeline_mode = #tpu.pipeline_mode<synchronous>, transform_indices = @transform_3, window_bounds = array<i64: 1, 128>}, {transform_indices = @transform_4, window_bounds = array<i64: 2, 16, 128>}]} {
    %c0 = arith.constant 0 : index
    %c0_0 = arith.constant 0 : index
    %c0_1 = arith.constant 0 : index
    %0 = vector.load %arg1[%c0, %c0_0, %c0_1] : memref<2x16x128xf32, #tpu.memory_space<vmem>>, vector<2x16x128xf32>
    %c0_2 = arith.constant 0 : index
    %c0_3 = arith.constant 0 : index
    %1 = vector.load %arg3[%c0_2, %c0_3] : memref<1x128xf32, #tpu.memory_space<vmem>>, vector<1x128xf32>
    %2 = vector.shape_cast %1 : vector<1x128xf32> to vector<1x1x128xf32>
    %3 = vector.broadcast %2 : vector<1x1x128xf32> to vector<2x16x128xf32>
    %4 = arith.mulf %0, %3 : vector<2x16x128xf32>
    %c0_4 = arith.constant 0 : index
    %c0_5 = arith.constant 0 : index
    %5 = vector.load %arg4[%c0_4, %c0_5] : memref<1x128xf32, #tpu.memory_space<vmem>>, vector<1x128xf32>
    %6 = vector.shape_cast %5 : vector<1x128xf32> to vector<1x1x128xf32>
    %7 = vector.broadcast %6 : vector<1x1x128xf32> to vector<2x16x128xf32>
    %8 = arith.addf %4, %7 : vector<2x16x128xf32>
    %c0_6 = arith.constant 0 : index
    %c0_7 = arith.constant 0 : index
    %c0_8 = arith.constant 0 : index
    %9 = vector.load %arg2[%c0_6, %c0_7, %c0_8] : memref<2x16x128xf32, #tpu.memory_space<vmem>>, vector<2x16x128xf32>
    %10 = arith.addf %8, %9 : vector<2x16x128xf32>
    %cst = arith.constant 0.000000e+00 : f32
    %11 = vector.broadcast %cst : f32 to vector<2x16x128xf32>
    %12 = arith.maximumf %10, %11 : vector<2x16x128xf32>
    %c0_9 = arith.constant 0 : index
    %c0_10 = arith.constant 0 : index
    %c0_11 = arith.constant 0 : index
    %13 = vector.load %arg5[%c0_9, %c0_10, %c0_11] : memref<2x16x128xf32, #tpu.memory_space<vmem>>, vector<2x16x128xf32>
    tpu.vector_store %arg5[%c0_9, %c0_10, %c0_11], %12 {strides = array<i32>} : memref<2x16x128xf32, #tpu.memory_space<vmem>>, vector<2x16x128xf32>,
    return
  }
  func.func @transform_0(%arg0: i32) -> (i32, i32, i32) {
    %c0_i32 = arith.constant 0 : i32
    %c0_i32_0 = arith.constant 0 : i32
    %c0_i32_1 = arith.constant 0 : i32
    return %arg0, %c0_i32, %c0_i32_0 : i32, i32, i32
  }
  func.func @transform_1(%arg0: i32) -> (i32, i32, i32) {
    %c0_i32 = arith.constant 0 : i32
    %c0_i32_0 = arith.constant 0 : i32
    %c0_i32_1 = arith.constant 0 : i32
    return %arg0, %c0_i32, %c0_i32_0 : i32, i32, i32
  }
  func.func @transform_2(%arg0: i32) -> (i32, i32) {
    %c0_i32 = arith.constant 0 : i32
    %c0_i32_0 = arith.constant 0 : i32
    %c0_i32_1 = arith.constant 0 : i32
    return %c0_i32, %c0_i32_0 : i32, i32
  }
  func.func @transform_3(%arg0: i32) -> (i32, i32) {
    %c0_i32 = arith.constant 0 : i32
    %c0_i32_0 = arith.constant 0 : i32
    %c0_i32_1 = arith.constant 0 : i32
    return %c0_i32, %c0_i32_0 : i32, i32
  }
  func.func @transform_4(%arg0: i32) -> (i32, i32, i32) {
    %c0_i32 = arith.constant 0 : i32
    %c0_i32_0 = arith.constant 0 : i32
    %c0_i32_1 = arith.constant 0 : i32
    return %arg0, %c0_i32, %c0_i32_0 : i32, i32, i32
  }
}

module attributes {stable_mosaic.version = 11 : i64} {
  func.func @conv_bn_stats_kernel(%arg0: i32, %arg1: memref<2x16x128xf32, #tpu.memory_space<vmem>>, %arg2: memref<384x128xf32, #tpu.memory_space<vmem>>, %arg3: memref<1x128xf32, #tpu.memory_space<vmem>>, %arg4: memref<1x128xf32, #tpu.memory_space<vmem>>, %arg5: memref<2x16x128xf32, #tpu.memory_space<vmem>>, %arg6: memref<1x2x128xf32, #tpu.memory_space<vmem>>) attributes {dimension_semantics = [#tpu.dimension_semantics<parallel>], iteration_bounds = array<i64: 4>, scalar_prefetch = 0 : i64, scratch_operands = 0 : i64, tpu.core_type = #tpu.core_type<tc>, window_params = [{transform_indices = @transform_0, window_bounds = array<i64: 2, 16, 128>}, {pipeline_mode = #tpu.pipeline_mode<synchronous>, transform_indices = @transform_1, window_bounds = array<i64: 384, 128>}, {pipeline_mode = #tpu.pipeline_mode<synchronous>, transform_indices = @transform_2, window_bounds = array<i64: 1, 128>}, {pipeline_mode = #tpu.pipeline_mode<synchronous>, transform_indices = @transform_3, window_bounds = array<i64: 1, 128>}, {transform_indices = @transform_4, window_bounds = array<i64: 2, 16, 128>}, {transform_indices = @transform_5, window_bounds = array<i64: 1, 2, 128>}]} {
    %c0 = arith.constant 0 : index
    %c0_0 = arith.constant 0 : index
    %c0_1 = arith.constant 0 : index
    %0 = vector.load %arg1[%c0, %c0_0, %c0_1] : memref<2x16x128xf32, #tpu.memory_space<vmem>>, vector<2x16x128xf32>
    %c0_2 = arith.constant 0 : index
    %c0_3 = arith.constant 0 : index
    %1 = vector.load %arg3[%c0_2, %c0_3] : memref<1x128xf32, #tpu.memory_space<vmem>>, vector<1x128xf32>
    %2 = vector.shape_cast %1 : vector<1x128xf32> to vector<1x1x128xf32>
    %3 = vector.broadcast %2 : vector<1x1x128xf32> to vector<2x16x128xf32>
    %4 = arith.mulf %0, %3 : vector<2x16x128xf32>
    %c0_4 = arith.constant 0 : index
    %c0_5 = arith.constant 0 : index
    %5 = vector.load %arg4[%c0_4, %c0_5] : memref<1x128xf32, #tpu.memory_space<vmem>>, vector<1x128xf32>
    %6 = vector.shape_cast %5 : vector<1x128xf32> to vector<1x1x128xf32>
    %7 = vector.broadcast %6 : vector<1x1x128xf32> to vector<2x16x128xf32>
    %8 = arith.addf %4, %7 : vector<2x16x128xf32>
    %cst = arith.constant 0.000000e+00 : f32
    %9 = vector.broadcast %cst : f32 to vector<2x16x128xf32>
    %10 = arith.maximumf %8, %9 : vector<2x16x128xf32>
    %cst_6 = arith.constant 0.000000e+00 : f32
    %11 = vector.broadcast %cst_6 : f32 to vector<2x1x128xf32>
    %12 = tpu.concatenate %11, %10, %11 in 1 : vector<2x1x128xf32>, vector<2x16x128xf32>, vector<2x1x128xf32> -> vector<2x18x128xf32>
    %13 = vector.extract_strided_slice %12 {offsets = [0, 0, 0], sizes = [2, 16, 128], strides = [1, 1, 1]} : vector<2x18x128xf32> to vector<2x16x128xf32>
    %14 = vector.extract_strided_slice %12 {offsets = [0, 1, 0], sizes = [2, 16, 128], strides = [1, 1, 1]} : vector<2x18x128xf32> to vector<2x16x128xf32>
    %15 = vector.extract_strided_slice %12 {offsets = [0, 2, 0], sizes = [2, 16, 128], strides = [1, 1, 1]} : vector<2x18x128xf32> to vector<2x16x128xf32>
    %16 = tpu.concatenate %13, %14, %15 in 2 : vector<2x16x128xf32>, vector<2x16x128xf32>, vector<2x16x128xf32> -> vector<2x16x384xf32>
    %17 = vector.shape_cast %16 : vector<2x16x384xf32> to vector<32x384xf32>
    %c0_7 = arith.constant 0 : index
    %c0_8 = arith.constant 0 : index
    %18 = vector.load %arg2[%c0_7, %c0_8] : memref<384x128xf32, #tpu.memory_space<vmem>>, vector<384x128xf32>
    %cst_9 = arith.constant dense<0.000000e+00> : vector<32x128xf32>
    %19 = tpu.matmul %17, %18, %cst_9 {dimension_numbers = #tpu.dot_dimension_numbers<[1], [0], [0], [1], [0, 0, 1, 1], [], []>} : vector<32x384xf32>, vector<384x128xf32>, vector<32x128xf32> -> vector<32x128xf32>
    %cst_10 = arith.constant dense<0.000000e+00> : vector<128xf32>
    %20 = vector.multi_reduction <add>, %19, %cst_10 [0] : vector<32x128xf32> to vector<128xf32>
    %21 = vector.shape_cast %20 : vector<128xf32> to vector<1x128xf32>
    %c0_11 = arith.constant 0 : index
    %c0_12 = arith.constant 0 : index
    %c0_13 = arith.constant 0 : index
    %22 = vector.load %arg6[%c0_11, %c0_12, %c0_13] : memref<1x2x128xf32, #tpu.memory_space<vmem>>, vector<1x1x128xf32>
    %23 = vector.shape_cast %22 : vector<1x1x128xf32> to vector<1x128xf32>
    %24 = vector.shape_cast %21 : vector<1x128xf32> to vector<1x1x128xf32>
    tpu.vector_store %arg6[%c0_11, %c0_12, %c0_13], %24 {strides = array<i32>} : memref<1x2x128xf32, #tpu.memory_space<vmem>>, vector<1x1x128xf32>,
    %25 = arith.mulf %19, %19 : vector<32x128xf32>
    %cst_14 = arith.constant dense<0.000000e+00> : vector<128xf32>
    %26 = vector.multi_reduction <add>, %25, %cst_14 [0] : vector<32x128xf32> to vector<128xf32>
    %27 = vector.shape_cast %26 : vector<128xf32> to vector<1x128xf32>
    %c0_15 = arith.constant 0 : index
    %c1 = arith.constant 1 : index
    %c0_16 = arith.constant 0 : index
    %28 = vector.load %arg6[%c0_15, %c1, %c0_16] : memref<1x2x128xf32, #tpu.memory_space<vmem>>, vector<1x1x128xf32>
    %29 = vector.shape_cast %28 : vector<1x1x128xf32> to vector<1x128xf32>
    %30 = vector.shape_cast %27 : vector<1x128xf32> to vector<1x1x128xf32>
    tpu.vector_store %arg6[%c0_15, %c1, %c0_16], %30 {strides = array<i32>} : memref<1x2x128xf32, #tpu.memory_space<vmem>>, vector<1x1x128xf32>,
    %31 = vector.shape_cast %19 : vector<32x128xf32> to vector<2x16x128xf32>
    %c0_17 = arith.constant 0 : index
    %c0_18 = arith.constant 0 : index
    %c0_19 = arith.constant 0 : index
    %32 = vector.load %arg5[%c0_17, %c0_18, %c0_19] : memref<2x16x128xf32, #tpu.memory_space<vmem>>, vector<2x16x128xf32>
    tpu.vector_store %arg5[%c0_17, %c0_18, %c0_19], %31 {strides = array<i32>} : memref<2x16x128xf32, #tpu.memory_space<vmem>>, vector<2x16x128xf32>,
    return
  }
  func.func @transform_0(%arg0: i32) -> (i32, i32, i32) {
    %c0_i32 = arith.constant 0 : i32
    %c0_i32_0 = arith.constant 0 : i32
    %c0_i32_1 = arith.constant 0 : i32
    return %arg0, %c0_i32, %c0_i32_0 : i32, i32, i32
  }
  func.func @transform_1(%arg0: i32) -> (i32, i32) {
    %c0_i32 = arith.constant 0 : i32
    %c0_i32_0 = arith.constant 0 : i32
    %c0_i32_1 = arith.constant 0 : i32
    return %c0_i32, %c0_i32_0 : i32, i32
  }
  func.func @transform_2(%arg0: i32) -> (i32, i32) {
    %c0_i32 = arith.constant 0 : i32
    %c0_i32_0 = arith.constant 0 : i32
    %c0_i32_1 = arith.constant 0 : i32
    return %c0_i32, %c0_i32_0 : i32, i32
  }
  func.func @transform_3(%arg0: i32) -> (i32, i32) {
    %c0_i32 = arith.constant 0 : i32
    %c0_i32_0 = arith.constant 0 : i32
    %c0_i32_1 = arith.constant 0 : i32
    return %c0_i32, %c0_i32_0 : i32, i32
  }
  func.func @transform_4(%arg0: i32) -> (i32, i32, i32) {
    %c0_i32 = arith.constant 0 : i32
    %c0_i32_0 = arith.constant 0 : i32
    %c0_i32_1 = arith.constant 0 : i32
    return %arg0, %c0_i32, %c0_i32_0 : i32, i32, i32
  }
  func.func @transform_5(%arg0: i32) -> (i32, i32, i32) {
    %c0_i32 = arith.constant 0 : i32
    %c0_i32_0 = arith.constant 0 : i32
    %c0_i32_1 = arith.constant 0 : i32
    return %arg0, %c0_i32, %c0_i32_0 : i32, i32, i32
  }
}

</mosaic_0001>

<bundles_post_ra>
// kernel: tile.23
= control target key start
LH: loop header
LB: loop body
LE: loop exit
PB: predicated region body
PF: predicated region fallthrough
CT: control target
= control target key end

     0   :  { %s28_s0 = inlined_call_operand.vmem [shape: f32[8], index: 0, kind: input, shape index: {}]   ;;  %s29_s1 = inlined_call_operand.vmem [shape: f32[16,8], index: 1, kind: output, shape index: {}]  }
   0x1   :  { %v4_v0 = vld [vmem:[%s28_s0] ss:$0 sm:$0xff] }
   0x2   :  { %5 = vst [vmem:[%s29_s1] sm:$0xff] %v4_v0 }
   0x3   :  { %8 = vst [vmem:[%s29_s1 + $0x8] sm:$0xff] %v4_v0 }

// kernel: tile.24
= control target key start
LH: loop header
LB: loop body
LE: loop exit
PB: predicated region body
PF: predicated region fallthrough
CT: control target
= control target key end

     0   :  { %s131_s10 = smov 120   ;;  %s132_s11 = smov 104   ;;  %vm3_vm0 = vcmask 64512   ;;  %vm9_vm1 = vcmask 1048512   ;;  %vm15_vm2 = vcmask 982912   ;;  %vm21_vm3 = vcmask 917312   ;;  %s207_s0 = inlined_call_operand.vmem [shape: f32[16,8], index: 0, kind: input, shape index: {}]   ;;  %s208_s1 = inlined_call_operand.vmem [shape: f32[1,128], index: 1, kind: output, shape index: {}]  }
   0x1   :  { %v101_v0 = vld [vmem:[%s207_s0 + $0xf] sm:$0x1]   ;;  %v103_v1 = vld [vmem:[%s207_s0 + $0xd] sm:$0x1]   ;;  %v105_v2 = vld [vmem:[%s207_s0 + $0xb] sm:$0x1]  }
   0x2   :  { %7 = vrot.lane.b32.xlu0 %v101_v0, %s131_s10  ;;  %19 = vrot.lane.b32.xlu1 %v103_v1, %s132_s11  ;;  %s133_s14 = smov 88   ;;  %v102_v3 = vld [vmem:[%s207_s0 + $0xe] sm:$0x1]   ;;  %v104_v4 = vld [vmem:[%s207_s0 + $0xc] sm:$0x1]   ;;  %s134_s19 = smov 112  }
   0x3   :  { %31 = vrot.lane.b32.xlu2 %v105_v2, %s133_s14  ;;  %s135_s20 = smov 96   ;;  %v106_v5 = vld [vmem:[%s207_s0 + $0xa] sm:$0x1]   ;;  %s136_s23 = smov 80   ;;  %v107_v6 = vld [vmem:[%s207_s0 + $0x9] sm:$0x1]  }
   0x4   :  { %v108_v7 = vld [vmem:[%s207_s0 + $0x8] sm:$0x1]   ;;  %s137_s28 = smov 72   ;;  %s138_s29 = smov 64   ;;  %v109_v8 = vld [vmem:[%s207_s0 + $0x7] sm:$0x1]  }
   0x5   :  { %s139_s3 = smov 56   ;;  %v110_v9 = vld [vmem:[%s207_s0 + $0x6] sm:$0x1]   ;;  %v111_v10 = vld [vmem:[%s207_s0 + $0x5] sm:$0x1]   ;;  %s140_s8 = smov 48  }
   0x6   :  { %s141_s9 = smov 40   ;;  %v112_v11 = vld [vmem:[%s207_s0 + $0x4] sm:$0x1]   ;;  %s142_s12 = smov 32   ;;  %v113_v12 = vld [vmem:[%s207_s0 + $0x3] sm:$0x1]  }
   0x7   :  { %v114_v13 = vld [vmem:[%s207_s0 + $0x2] sm:$0x1]   ;;  %s143_s17 = smov 24   ;;  %s144_s18 = smov 16   ;;  %v115_v14 = vld [vmem:[%s207_s0 + $0x1] sm:$0x1]  }
   0x8   :  { %s145_s21 = smov 8   ;;  %v2_v15 = vld [vmem:[%s207_s0] sm:$0x1]   ;;  %vm27_vm4 = vcmask 851712   ;;  %vm33_vm5 = vcmask 786112   ;;  %vm39_vm6 = vcmask 720512  }
   0x9   :  { %4 = vst.msk [vmem:[#allocation0] sm:$0x1] %vm3_vm0, %v2_v15   ;;  %vm45_vm7 = vcmask 654912   ;;  %vm51_vm8 = vcmask 589312   ;;  %vm57_vm9 = vcmask 523712   ;;  %vm63_vm10 = vcmask 458112  }
   0xa   :  { %13 = vrot.lane.b32.xlu0 %v102_v3, %s134_s19  ;;  %25 = vrot.lane.b32.xlu1 %v104_v4, %s135_s20  ;;  %vm69_vm11 = vcmask 392512   ;;  %vm75_vm12 = vcmask 326912   ;;  %vm81_vm13 = vcmask 261312   ;;  %vm87_vm14 = vcmask 195712  }
   0xb   :  { %37 = vrot.lane.b32.xlu2 %v106_v5, %s136_s23  ;;  %vm93_vm15 = vcmask 130112  }
  0x12   :  { %43 = vrot.lane.b32.xlu0 %v107_v6, %s137_s28  ;;  %49 = vrot.lane.b32.xlu1 %v108_v7, %s138_s29 }
  0x13   :  { %55 = vrot.lane.b32.xlu2 %v109_v8, %s139_s3 }
  0x1a   :  { %61 = vrot.lane.b32.xlu0 %v110_v9, %s140_s8  ;;  %67 = vrot.lane.b32.xlu1 %v111_v10, %s141_s9 }
  0x1b   :  { %73 = vrot.lane.b32.xlu2 %v112_v11, %s142_s12 }
  0x22   :  { %79 = vrot.lane.b32.xlu0 %v113_v12, %s143_s17  ;;  %85 = vrot.lane.b32.xlu1 %v114_v13, %s144_s18 }
  0x23   :  { %91 = vrot.lane.b32.xlu2 %v115_v14, %s145_s21 }
  0x5d   :  { %v32_v16 = vpop.permute.xlu2 %31  }
  0x65   :  { %v38_v17 = vpop.permute.xlu2 %37  }
  0x6d   :  { %v56_v18 = vpop.permute.xlu2 %55  }
  0x74   :  { %v8_v19 = vpop.permute.xlu0 %7   ;;  %v20_v20 = vpop.permute.xlu1 %19  }
  0x75   :  { %10 = vst.msk [vmem:[#allocation0] sm:$0x1] %vm9_vm1, %v8_v19   ;;  %v74_v21 = vpop.permute.xlu2 %73  }
  0x7c   :  { %v14_v22 = vpop.permute.xlu0 %13   ;;  %v26_v23 = vpop.permute.xlu1 %25  }
  0x7d   :  { %16 = vst.msk [vmem:[#allocation0] sm:$0x1] %vm15_vm2, %v14_v22   ;;  %v92_v24 = vpop.permute.xlu2 %91  }
  0x7e   :  { %22 = vst.msk [vmem:[#allocation0] sm:$0x1] %vm21_vm3, %v20_v20  }
  0x7f   :  { %28 = vst.msk [vmem:[#allocation0] sm:$0x1] %vm27_vm4, %v26_v23  }
  0x80   :  { %34 = vst.msk [vmem:[#allocation0] sm:$0x1] %vm33_vm5, %v32_v16  }
  0x81   :  { %40 = vst.msk [vmem:[#allocation0] sm:$0x1] %vm39_vm6, %v38_v17  }
  0x84   :  { %v44_v25 = vpop.permute.xlu0 %43   ;;  %v50_v26 = vpop.permute.xlu1 %49  }
  0x85   :  { %46 = vst.msk [vmem:[#allocation0] sm:$0x1] %vm45_vm7, %v44_v25  }
  0x86   :  { %52 = vst.msk [vmem:[#allocation0] sm:$0x1] %vm51_vm8, %v50_v26  }
  0x87   :  { %58 = vst.msk [vmem:[#allocation0] sm:$0x1] %vm57_vm9, %v56_v18  }
  0x8c   :  { %v62_v27 = vpop.permute.xlu0 %61   ;;  %v68_v28 = vpop.permute.xlu1 %67  }
  0x8d   :  { %64 = vst.msk [vmem:[#allocation0] sm:$0x1] %vm63_vm10, %v62_v27  }
  0x8e   :  { %70 = vst.msk [vmem:[#allocation0] sm:$0x1] %vm69_vm11, %v68_v28  }
  0x8f   :  { %76 = vst.msk [vmem:[#allocation0] sm:$0x1] %vm75_vm12, %v74_v21  }
  0x94   :  { %v80_v29 = vpop.permute.xlu0 %79   ;;  %v86_v30 = vpop.permute.xlu1 %85  }
  0x95   :  { %82 = vst.msk [vmem:[#allocation0] sm:$0x1] %vm81_vm13, %v80_v29  }
  0x96   :  { %88 = vst.msk [vmem:[#allocation0] sm:$0x1] %vm87_vm14, %v86_v30  }
  0x97   :  { %94 = vst.msk [vmem:[#allocation0] sm:$0x1] %vm93_vm15, %v92_v24  }
  0x9e   :  { %v97_v31 = vld [vmem:[#allocation0] sm:$0x1] }
  0x9f   :  { %100 = vst [vmem:[%s208_s1] sm:$0x1] %v97_v31 }

// kernel: resblock_pallas.3
= control target key start
LH: loop header
LB: loop body
LE: loop exit
PB: predicated region body
PF: predicated region fallthrough
CT: control target
= control target key end

     0   :  { %s573_s12 = smov 0   ;;  %s793_s0 = inlined_call_operand.vmem [shape: f32[8,16,128], index: 0, kind: input, shape index: {}]   ;;  %s794_s1 = inlined_call_operand.vmem [shape: f32[384,128], index: 1, kind: input, shape index: {}]   ;;  %s795_s2 = inlined_call_operand.vmem [shape: f32[8,16,128], index: 2, kind: output, shape index: {0}]   ;;  %s796_s3 = inlined_call_operand.vmem [shape: f32[4,2,128], index: 3, kind: output, shape index: {1}]  }
   0x1 LB: > { %s579_s13 = sadd.s32 4294967295, %s551_s12   ;;  %p505_p0 = scmp.ge.s32.totalorder %s551_s12, 1  ;;  %s551_s12 = sphi %s573_s12, %s14_s12  }
   0x2   : > { %p142_p1 = scmp.lt.s32.totalorder %s551_s12, 5 }
   0x4   : > { %p143_p2 = pnand %p505_p0, %p142_p1 }
   0x5   : > { %s506_s20 = sshll.u32 (!%p143_p2), %s579_s13, 1  ;;  %p186_p4 = scmp.lt.s32.totalorder (!%p143_p2), %s579_s13, 3 }
   0x6   : > { %146 = sbr.rel (%p143_p2) target bundleno = 218 (0xda), region = 28  ;;  %p599_p3 = scmp.lt.s32.totalorder (!%p143_p2), %s506_s20, 7 }
   0xb   : > { %v296_v0 = vld [vmem:[%s794_s1 + $0x178] sm:$0xff]  ;;  %v295_v1 = vld [vmem:[%s794_s1 + $0x170] sm:$0xff]  ;;  %v294_v5 = vld [vmem:[%s794_s1 + $0x168] sm:$0xff]  ;;  %s801_s20 = smov (!%p599_p3, %s506_s20), 7  ;;  %vm198_vm0 = vcmask 1040384   ;;  %vm234_vm1 = vcmask 1045504  }
   0xc   : > { %v264_v2 = vld [vmem:[%s794_s1 + $0x78] sm:$0xff]  ;;  %355 = vmatpush.msra.mxu2 %v296_v0  ;;  %v263_v4 = vld [vmem:[%s794_s1 + $0x70] sm:$0xff]  ;;  %v262_v7 = vld [vmem:[%s794_s1 + $0x68] sm:$0xff]  ;;  %s519_s28 = sshll.u32 %s801_s20, 4  ;;  %vm219_vm2 = vcmask 1046528   ;;  %s803_s13 = smov (!%p186_p4, %s579_s13), 3 }
   0xd   : > { %297 = vmatpush.msra.mxu0 %v264_v2  ;;  %v280_v3 = vld [vmem:[%s794_s1 + $0xf8] sm:$0xff]  ;;  %521 = vmatpush.msra.mxu3 %v264_v2  ;;  %v279_v6 = vld [vmem:[%s794_s1 + $0xf0] sm:$0xff]  ;;  %v278_v8 = vld [vmem:[%s794_s1 + $0xe8] sm:$0xff]  ;;  %s667_s16 = scalar_lea.vmem %s793_s0, %s519_s28  ;;  %s779_s25 = scalar_lea.vmem %s795_s2, %s519_s28 }
   0xe   : > { %326 = vmatpush.msra.mxu1 %v280_v3  ;;  %356 = vmatpush.msra.mxu2 %v295_v1  ;;  %v293_v9 = vld [vmem:[%s794_s1 + $0x160] sm:$0xff]  ;;  %v292_v12 = vld [vmem:[%s794_s1 + $0x158] sm:$0xff]  ;;  %v291_v15 = vld [vmem:[%s794_s1 + $0x150] sm:$0xff]  ;;  %s512_s20 = sshll.u32 %s803_s13, 1 }
   0xf   : > { %298 = vmatpush.msra.mxu0 %v263_v4  ;;  %522 = vmatpush.msra.mxu3 %v263_v4  ;;  %v261_v10 = vld [vmem:[%s794_s1 + $0x60] sm:$0xff]  ;;  %v260_v13 = vld [vmem:[%s794_s1 + $0x58] sm:$0xff]  ;;  %v259_v16 = vld [vmem:[%s794_s1 + $0x50] sm:$0xff]  ;;  %s189_s27 = scalar_lea.vmem %s796_s3, %s512_s20 }
  0x10   : > { %327 = vmatpush.msra.mxu1 %v279_v6  ;;  %357 = vmatpush.msra.mxu2 %v294_v5  ;;  %v277_v11 = vld [vmem:[%s794_s1 + $0xe0] sm:$0xff]  ;;  %v276_v14 = vld [vmem:[%s794_s1 + $0xd8] sm:$0xff]  ;;  %v275_v17 = vld [vmem:[%s794_s1 + $0xd0] sm:$0xff] }
  0x11   : > { %299 = vmatpush.msra.mxu0 %v262_v7  ;;  %523 = vmatpush.msra.mxu3 %v262_v7  ;;  %v290_v18 = vld [vmem:[%s794_s1 + $0x148] sm:$0xff]  ;;  %v289_v21 = vld [vmem:[%s794_s1 + $0x140] sm:$0xff]  ;;  %v288_v24 = vld [vmem:[%s794_s1 + $0x138] sm:$0xff] }
  0x12   : > { %328 = vmatpush.msra.mxu1 %v278_v8  ;;  %358 = vmatpush.msra.mxu2 %v293_v9  ;;  %v258_v19 = vld [vmem:[%s794_s1 + $0x48] sm:$0xff]  ;;  %v257_v22 = vld [vmem:[%s794_s1 + $0x40] sm:$0xff]  ;;  %v256_v25 = vld [vmem:[%s794_s1 + $0x38] sm:$0xff] }
  0x13   : > { %300 = vmatpush.msra.mxu0 %v261_v10  ;;  %524 = vmatpush.msra.mxu3 %v261_v10  ;;  %v274_v20 = vld [vmem:[%s794_s1 + $0xc8] sm:$0xff]  ;;  %v273_v23 = vld [vmem:[%s794_s1 + $0xc0] sm:$0xff]  ;;  %v272_v26 = vld [vmem:[%s794_s1 + $0xb8] sm:$0xff] }
  0x14   : > { %329 = vmatpush.msra.mxu1 %v277_v11  ;;  %359 = vmatpush.msra.mxu2 %v292_v12  ;;  %v190_v27 = vld [vmem:[%s667_s16] sm:$0xff]  ;;  %v683_v28 = vld [vmem:[%s667_s16 + $0x8] sm:$0xff]  ;;  %v287_v29 = vld [vmem:[%s794_s1 + $0x130] sm:$0xff] }
  0x15   : > { %301 = vmatpush.msra.mxu0 %v260_v13  ;;  %525 = vmatpush.msra.mxu3 %v260_v13  ;;  %v255_v30 = vld [vmem:[%s794_s1 + $0x30] sm:$0xff]  ;;  %v286_v32 = vld [vmem:[%s794_s1 + $0x128] sm:$0xff]  ;;  %v199_v34 = vrot.slane %v190_v27, 7  ;;  %v200_v35 = vrot.slane %v683_v28, 7  ;;  %v285_v37 = vld [vmem:[%s794_s1 + $0x120] sm:$0xff] }
  0x16   : > { %330 = vmatpush.msra.mxu1 %v276_v14  ;;  %360 = vmatpush.msra.mxu2 %v291_v15  ;;  %v271_v31 = vld [vmem:[%s794_s1 + $0xb0] sm:$0xff]  ;;  %v254_v33 = vld [vmem:[%s794_s1 + $0x28] sm:$0xff]  ;;  %v253_v38 = vld [vmem:[%s794_s1 + $0x20] sm:$0xff] }
  0x17   : > { %302 = vmatpush.msra.mxu0 %v259_v16  ;;  %526 = vmatpush.msra.mxu3 %v259_v16  ;;  %v270_v36 = vld [vmem:[%s794_s1 + $0xa8] sm:$0xff]  ;;  %v269_v39 = vld [vmem:[%s794_s1 + $0xa0] sm:$0xff]  ;;  %v284_v40 = vld [vmem:[%s794_s1 + $0x118] sm:$0xff]  ;;  %v201_v42 = vsel %vm198_vm0, %v199_v34, %v200_v35  ;;  %v211_v43 = vsel %vm198_vm0, 0.0, %v199_v34  ;;  %v213_v61 = vsel %vm198_vm0, %v200_v35, 0.0 }
  0x18   : > { %331 = vmatpush.msra.mxu1 %v275_v17  ;;  %361 = vmatpush.msra.mxu2 %v290_v18  ;;  %v252_v41 = vld [vmem:[%s794_s1 + $0x18] sm:$0xff]  ;;  %v283_v45 = vld [vmem:[%s794_s1 + $0x110] sm:$0xff]  ;;  %v235_v48 = vrot.slane %v211_v43, 2  ;;  %v236_v49 = vrot.slane %v201_v42, 2  ;;  %v282_v50 = vld [vmem:[%s794_s1 + $0x108] sm:$0xff]  ;;  %v220_v52 = vrot.slane %v211_v43, 1 }
  0x19   : > { %303 = vmatpush.msra.mxu0 %v258_v19  ;;  %527 = vmatpush.msra.mxu3 %v258_v19  ;;  %v268_v44 = vld [vmem:[%s794_s1 + $0x98] sm:$0xff]  ;;  %v251_v46 = vld [vmem:[%s794_s1 + $0x10] sm:$0xff]  ;;  %v250_v51 = vld [vmem:[%s794_s1 + $0x8] sm:$0xff]  ;;  %v221_v53 = vrot.slane %v201_v42, 1  ;;  %v238_v0 = vrot.slane %v213_v61, 2  ;;  %v223_v1 = vrot.slane %v213_v61, 1 }
  0x1a   : > { %332 = vmatpush.msra.mxu1 %v274_v20  ;;  %362 = vmatpush.msra.mxu2 %v289_v21  ;;  %v267_v47 = vld [vmem:[%s794_s1 + $0x90] sm:$0xff]  ;;  %v266_v54 = vld [vmem:[%s794_s1 + $0x88] sm:$0xff]  ;;  %v281_v55 = vld [vmem:[%s794_s1 + $0x100] sm:$0xff]  ;;  %v237_v57 = vsel %vm234_vm1, %v235_v48, %v236_v49 }
  0x1b   : > { %304 = vmatpush.msra.mxu0 %v257_v22  ;;  %528 = vmatpush.msra.mxu3 %v257_v22  ;;  %v249_v56 = vld [vmem:[%s794_s1] sm:$0xff]  ;;  %vm753_vm3 = vmneg %vm198_vm0  ;;  %v222_v60 = vsel %vm219_vm2, %v220_v52, %v221_v53  ;;  %v192_v62 = vld [vmem:[%s667_s16 + $0x10] sm:$0xff]  ;;  %v239_v4 = vsel %vm234_vm1, %v236_v49, %v238_v0  ;;  %v224_v5 = vsel %vm219_vm2, %v221_v53, %v223_v1 }
  0x1c   : > { %333 = vmatpush.msra.mxu1 %v273_v23  ;;  %363 = vmatpush.msra.mxu2 %v288_v24  ;;  %v265_v58 = vld [vmem:[%s794_s1 + $0x80] sm:$0xff]  ;;  %v193_v63 = vld [vmem:[%s667_s16 + $0x18] sm:$0xff]  ;;  %v202_v2 = vrot.slane %v192_v62, 7 }
  0x1d   : > { %305 = vmatpush.msra.mxu0 %v256_v25  ;;  %529 = vmatpush.msra.mxu3 %v256_v25  ;;  %v203_v3 = vrot.slane %v193_v63, 7 }
  0x1e   : > { %334 = vmatpush.msra.mxu1 %v272_v26  ;;  %364 = vmatpush.msra.mxu2 %v287_v29  ;;  %v212_v7 = vsel %vm198_vm0, 0.0, %v202_v2 }
  0x1f   : > { %306 = vmatpush.msra.mxu0 %v255_v30  ;;  %530 = vmatpush.msra.mxu3 %v255_v30  ;;  %v204_v6 = vsel %vm198_vm0, %v202_v2, %v203_v3  ;;  %v240_v8 = vrot.slane %v212_v7, 2  ;;  %v225_v10 = vrot.slane %v212_v7, 1  ;;  %v214_v14 = vsel %vm198_vm0, %v203_v3, 0.0 }
  0x20   : > { %335 = vmatpush.msra.mxu1 %v271_v31  ;;  %365 = vmatpush.msra.mxu2 %v286_v32  ;;  %v241_v9 = vrot.slane %v204_v6, 2  ;;  %v226_v11 = vrot.slane %v204_v6, 1  ;;  %v243_v15 = vrot.slane %v214_v14, 2  ;;  %v228_v16 = vrot.slane %v214_v14, 1 }
  0x21   : > { %307 = vmatpush.msra.mxu0 %v254_v33  ;;  %531 = vmatpush.msra.mxu3 %v254_v33 }
  0x22   : > { %336 = vmatpush.msra.mxu1 %v270_v36  ;;  %366 = vmatpush.msra.mxu2 %v285_v37  ;;  %v242_v12 = vsel %vm234_vm1, %v240_v8, %v241_v9  ;;  %v227_v13 = vsel %vm219_vm2, %v225_v10, %v226_v11  ;;  %v244_v17 = vsel %vm234_vm1, %v241_v9, %v243_v15 }
  0x23   : > { %308 = vmatpush.msra.mxu0 %v253_v38  ;;  %532 = vmatpush.msra.mxu3 %v253_v38  ;;  %v229_v18 = vsel %vm219_vm2, %v226_v11, %v228_v16 }
  0x24   : > { %337 = vmatpush.msra.mxu1 %v269_v39  ;;  %367 = vmatpush.msra.mxu2 %v284_v40 }
  0x25   : > { %309 = vmatpush.msra.mxu0 %v252_v41  ;;  %533 = vmatpush.msra.mxu3 %v252_v41 }
  0x26   : > { %338 = vmatpush.msra.mxu1 %v268_v44  ;;  %368 = vmatpush.msra.mxu2 %v283_v45 }
  0x27   : > { %310 = vmatpush.msra.mxu0 %v251_v46  ;;  %534 = vmatpush.msra.mxu3 %v251_v46 }
  0x28   : > { %339 = vmatpush.msra.mxu1 %v267_v47  ;;  %369 = vmatpush.msra.mxu2 %v282_v50 }
  0x29   : > { %311 = vmatpush.msra.mxu0 %v250_v51  ;;  %535 = vmatpush.msra.mxu3 %v250_v51 }
  0x2a   : > { %340 = vmatpush.msra.mxu1 %v266_v54  ;;  %370 = vmatpush.msra.mxu2 %v281_v55 }
  0x2b   : > { %312 = vmatpush.msra.mxu0 %v249_v56  ;;  %371 = vmatmul.f32.vlgmr.msra.gmra.mxu2 %v237_v57 }
  0x2c   : > { %341 = vmatpush.msra.mxu1 %v265_v58  ;;  %514 = vmatmul.msk.f32.vlgmr.msra.gmra.mxu0 %vm753_vm3, %v199_v34 }
  0x2d   : > { %342 = vmatmul.f32.vlgmr.msra.gmra.mxu1 %v222_v60  ;;  %536 = vmatpush.msra.mxu3 %v249_v56 }
  0x2e   : > { %316 = vmatmul.f32.vlgmr.msra.gmra.mxu3 %v201_v42 }
  0x33   : > { %374 = vmatmul.f32.gmra.mxu2 %v239_v4 }
  0x35   : > { %345 = vmatmul.f32.gmra.mxu1 %v224_v5 }
  0x36   : > { %516 = vmatmul.msk.f32.gmra.mxu3 %vm753_vm3, %v202_v2 }
  0x3b   : > { %377 = vmatmul.f32.gmra.mxu2 %v242_v12 }
  0x3d   : > { %348 = vmatmul.f32.gmra.mxu1 %v227_v13 }
  0x3e   : > { %322 = vmatmul.f32.gmra.mxu3 %v204_v6 }
  0x43   : > { %380 = vmatmul.f32.gmra.mxu2 %v244_v17 }
  0x45   : > { %351 = vmatmul.f32.gmra.mxu1 %v229_v18 }
  0xa9   : > { %v314_v19 = vpop.f32.mrf.mxu0 }
  0xaa   : > { %v343_v20 = vpop.f32.mrf.mxu1 }
  0xab   : > { %v344_v21 = vadd.f32 %v343_v20, %v314_v19 }
  0xae   : > { %v372_v22 = vpop.f32.mrf.mxu2 }
  0xaf   : > { %v373_v23 = vadd.f32 %v372_v22, %v344_v21 }
  0xb1   : > { %408 = vst [vmem:[%s779_s25] sm:$0xff] %v373_v23  ;;  %v317_v24 = vpop.f32.mrf.mxu3  ;;  %v394_v38 = vmul.f32 %v373_v23, %v373_v23 }
  0xb2   : > { %v346_v25 = vpop.f32.mrf.mxu1 }
  0xb3   : > { %v347_v26 = vadd.f32 %v346_v25, %v317_v24 }
  0xb6   : > { %v375_v27 = vpop.f32.mrf.mxu2 }
  0xb7   : > { %v376_v28 = vadd.f32 %v375_v27, %v347_v26 }
  0xb9   : > { %409 = vst [vmem:[%s779_s25 + $0x8] sm:$0xff] %v376_v28  ;;  %v320_v29 = vpop.f32.mrf.mxu3  ;;  %v395_v36 = vmul.f32 %v376_v28, %v376_v28  ;;  %v384_v39 = vadd.f32 %v376_v28, %v373_v23 }
  0xba   : > { %v349_v30 = vpop.f32.mrf.mxu1 }
  0xbb   : > { %v350_v31 = vadd.f32 %v349_v30, %v320_v29  ;;  %v398_v42 = vadd.f32 %v395_v36, %v394_v38 }
  0xbe   : > { %v378_v32 = vpop.f32.mrf.mxu2 }
  0xbf   : > { %v379_v33 = vadd.f32 %v378_v32, %v350_v31 }
  0xc1   : > { %410 = vst [vmem:[%s779_s25 + $0x10] sm:$0xff] %v379_v33  ;;  %v323_v34 = vpop.f32.mrf.mxu3  ;;  %v396_v40 = vmul.f32 %v379_v33, %v379_v33  ;;  %v385_v43 = vadd.f32 %v384_v39, %v379_v33 }
  0xc2   : > { %v352_v35 = vpop.f32.mrf.mxu1 }
  0xc3   : > { %v353_v37 = vadd.f32 %v352_v35, %v323_v34  ;;  %v399_v45 = vadd.f32 %v398_v42, %v396_v40 }
  0xc6   : > { %v381_v41 = vpop.f32.mrf.mxu2 }
  0xc7   : > { %v382_v44 = vadd.f32 %v381_v41, %v353_v37 }
  0xc9   : > { %v386_v46 = vadd.f32 %v385_v43, %v382_v44  ;;  %v397_v47 = vmul.f32 %v382_v44, %v382_v44  ;;  %411 = vst [vmem:[%s779_s25 + $0x18] sm:$0xff] %v382_v44 }
  0xcb   : > { %v387_v48 = vrot.slane %v386_v46, 4  ;;  %v400_v49 = vadd.f32 %v399_v45, %v397_v47 }
  0xcd   : > { %v388_v50 = vadd.f32 %v387_v48, %v386_v46  ;;  %v401_v51 = vrot.slane %v400_v49, 4 }
  0xcf   : > { %v389_v52 = vrot.slane %v388_v50, 2  ;;  %v402_v53 = vadd.f32 %v401_v51, %v400_v49 }
  0xd1   : > { %v390_v54 = vadd.f32 %v389_v52, %v388_v50  ;;  %v403_v55 = vrot.slane %v402_v53, 2 }
  0xd3   : > { %v391_v56 = vrot.slane %v390_v54, 1  ;;  %v404_v57 = vadd.f32 %v403_v55, %v402_v53 }
  0xd5   : > { %v392_v58 = vadd.f32 %v391_v56, %v390_v54  ;;  %v405_v59 = vrot.slane %v404_v57, 1 }
  0xd7   : > { %393 = vst [vmem:[%s189_s27] sm:$0x1] %v392_v58  ;;  %v406_v60 = vadd.f32 %v405_v59, %v404_v57 }
  0xd9   : > { %407 = vst [vmem:[%s189_s27 + $0x1] sm:$0x1] %v406_v60 }
  0xda PF: > { %s14_s12 = sadd.s32 1, %s551_s12  }
  0xdb   : > { %p11_p5 = scmp.ge.s32.totalorder %s14_s12, 6  }
  0xdd   :  { %13 = sbr.rel (!%p11_p5) target bundleno = 1 (0x1), region = 70 }

// kernel: resblock_pallas.5
= control target key start
LH: loop header
LB: loop body
LE: loop exit
PB: predicated region body
PF: predicated region fallthrough
CT: control target
= control target key end

     0   :  { %s399_s15 = smov 0   ;;  %s425_s0 = inlined_call_operand.vmem [shape: f32[8,16,128], index: 0, kind: input, shape index: {}, may-alias: {0,4}]   ;;  %s426_s1 = inlined_call_operand.vmem [shape: f32[8,16,128], index: 1, kind: input, shape index: {}]   ;;  %s427_s2 = inlined_call_operand.vmem [shape: f32[1,128], index: 2, kind: input, shape index: {}]   ;;  %s428_s3 = inlined_call_operand.vmem [shape: f32[1,128], index: 3, kind: input, shape index: {}]   ;;  %s429_s4 = inlined_call_operand.vmem [shape: f32[8,16,128], index: 4, kind: output, shape index: {}, may-alias: {0,4}]  }
   0x1 LB: > { %s337_s16 = sadd.s32 4294967295, %s372_s15   ;;  %p341_p0 = scmp.ge.s32.totalorder %s372_s15, 1  ;;  %s372_s15 = sphi %s399_s15, %s14_s15  }
   0x2   : > { %p176_p1 = scmp.lt.s32.totalorder %s372_s15, 5 }
   0x4   : > { %p177_p2 = pnand %p341_p0, %p176_p1 }
   0x5   : > { %s342_s17 = sshll.u32 (!%p177_p2), %s337_s16, 1 }
   0x6   : > { %180 = sbr.rel (%p177_p2) target bundleno = 27 (0x1b), region = 36  ;;  %p211_p3 = scmp.lt.s32.totalorder (!%p177_p2), %s342_s17, 7 }
   0xb   : > { %s431_s17 = smov (!%p211_p3, %s342_s17), 7  ;;  %v364_v0 = vld [vmem:[%s427_s2] ss:$0 sm:$0xff] }
   0xc   : > { %s353_s20 = sshll.u32 %s431_s17, 4  ;;  %v365_v1 = vld [vmem:[%s428_s3] ss:$0 sm:$0xff] }
   0xd   : > { %s215_s23 = scalar_lea.vmem %s425_s0, %s353_s20  ;;  %s222_s26 = scalar_lea.vmem %s426_s1, %s353_s20 }
   0xe   : > { %v231_v2 = vld [vmem:[%s215_s23] sm:$0xff]  ;;  %v233_v3 = vld [vmem:[%s215_s23 + $0x10] sm:$0xff]  ;;  %v232_v6 = vld [vmem:[%s215_s23 + $0x8] sm:$0xff]  ;;  %s229_s5 = scalar_lea.vmem %s429_s4, %s353_s20 }
   0xf   : > { %v239_v4 = vmul.f32 %v364_v0, %v231_v2  ;;  %v241_v5 = vmul.f32 %v364_v0, %v233_v3  ;;  %v234_v7 = vld [vmem:[%s215_s23 + $0x18] sm:$0xff]  ;;  %v251_v8 = vld [vmem:[%s222_s26] sm:$0xff]  ;;  %v240_v9 = vmul.f32 %v364_v0, %v232_v6  ;;  %v253_v11 = vld [vmem:[%s222_s26 + $0x10] sm:$0xff] }
  0x10   : > { %v242_v10 = vmul.f32 %v364_v0, %v234_v7  ;;  %v252_v14 = vld [vmem:[%s222_s26 + $0x8] sm:$0xff]  ;;  %v254_v15 = vld [vmem:[%s222_s26 + $0x18] sm:$0xff] }
  0x11   : > { %v247_v12 = vadd.f32 %v365_v1, %v239_v4  ;;  %v249_v13 = vadd.f32 %v365_v1, %v241_v5  ;;  %v248_v16 = vadd.f32 %v365_v1, %v240_v9 }
  0x12   : > { %v250_v17 = vadd.f32 %v365_v1, %v242_v10 }
  0x13   : > { %v255_v18 = vadd.f32 %v251_v8, %v247_v12  ;;  %v257_v19 = vadd.f32 %v253_v11, %v249_v13  ;;  %v256_v20 = vadd.f32 %v252_v14, %v248_v16 }
  0x14   : > { %v258_v21 = vadd.f32 %v254_v15, %v250_v17 }
  0x15   : > { %v259_v22 = vmax.f32 %v255_v18, 0.0  ;;  %v261_v23 = vmax.f32 %v257_v19, 0.0  ;;  %v260_v24 = vmax.f32 %v256_v20, 0.0 }
  0x16   : > { %v262_v25 = vmax.f32 %v258_v21, 0.0 }
  0x17   : > { %263 = vst [vmem:[%s229_s5] sm:$0xff] %v259_v22 }
  0x18   : > { %264 = vst [vmem:[%s229_s5 + $0x8] sm:$0xff] %v260_v24 }
  0x19   : > { %265 = vst [vmem:[%s229_s5 + $0x10] sm:$0xff] %v261_v23 }
  0x1a   : > { %266 = vst [vmem:[%s229_s5 + $0x18] sm:$0xff] %v262_v25 }
  0x1b PF: > { %s14_s15 = sadd.s32 1, %s372_s15  }
  0x1c   : > { %p11_p4 = scmp.ge.s32.totalorder %s14_s15, 6  }
  0x1e   :  { %13 = sbr.rel (!%p11_p4) target bundleno = 1 (0x1), region = 69 }

// kernel: resblock_pallas.4
= control target key start
LH: loop header
LB: loop body
LE: loop exit
PB: predicated region body
PF: predicated region fallthrough
CT: control target
= control target key end

     0   :  { %s659_s18 = smov 0   ;;  %s876_s0 = inlined_call_operand.vmem [shape: f32[8,16,128], index: 0, kind: input, shape index: {}]   ;;  %s877_s1 = inlined_call_operand.vmem [shape: f32[384,128], index: 1, kind: input, shape index: {}]   ;;  %s878_s2 = inlined_call_operand.vmem [shape: f32[1,128], index: 2, kind: input, shape index: {}]   ;;  %s879_s3 = inlined_call_operand.vmem [shape: f32[1,128], index: 3, kind: input, shape index: {}]   ;;  %s880_s4 = inlined_call_operand.vmem [shape: f32[8,16,128], index: 4, kind: output, shape index: {0}]   ;;  %s881_s5 = inlined_call_operand.vmem [shape: f32[4,2,128], index: 5, kind: output, shape index: {1}]  }
   0x1 LB: > { %s665_s19 = sadd.s32 4294967295, %s627_s18   ;;  %p579_p0 = scmp.ge.s32.totalorder %s627_s18, 1  ;;  %s627_s18 = sphi %s659_s18, %s16_s18  }
   0x2   : > { %p192_p1 = scmp.lt.s32.totalorder %s627_s18, 5 }
   0x4   : > { %p193_p2 = pnand %p579_p0, %p192_p1 }
   0x5   : > { %s580_s26 = sshll.u32 (!%p193_p2), %s665_s19, 1  ;;  %p240_p4 = scmp.lt.s32.totalorder (!%p193_p2), %s665_s19, 3 }
   0x6   : > { %196 = sbr.rel (%p193_p2) target bundleno = 218 (0xda), region = 36  ;;  %p227_p3 = scmp.lt.s32.totalorder (!%p193_p2), %s580_s26, 7 }
   0xb   : > { %v370_v0 = vld [vmem:[%s877_s1 + $0x178] sm:$0xff]  ;;  %v369_v1 = vld [vmem:[%s877_s1 + $0x170] sm:$0xff]  ;;  %v368_v5 = vld [vmem:[%s877_s1 + $0x168] sm:$0xff]  ;;  %s885_s26 = smov (!%p227_p3, %s580_s26), 7  ;;  %vm272_vm0 = vcmask 1040384   ;;  %vm308_vm1 = vcmask 1045504  }
   0xc   : > { %v338_v2 = vld [vmem:[%s877_s1 + $0x78] sm:$0xff]  ;;  %429 = vmatpush.msra.mxu2 %v370_v0  ;;  %v337_v4 = vld [vmem:[%s877_s1 + $0x70] sm:$0xff]  ;;  %v336_v7 = vld [vmem:[%s877_s1 + $0x68] sm:$0xff]  ;;  %s593_s8 = sshll.u32 %s885_s26, 4  ;;  %vm293_vm2 = vcmask 1046528   ;;  %s887_s19 = smov (!%p240_p4, %s665_s19), 3 }
   0xd   : > { %371 = vmatpush.msra.mxu0 %v338_v2  ;;  %v354_v3 = vld [vmem:[%s877_s1 + $0xf8] sm:$0xff]  ;;  %595 = vmatpush.msra.mxu3 %v338_v2  ;;  %v353_v6 = vld [vmem:[%s877_s1 + $0xf0] sm:$0xff]  ;;  %v352_v8 = vld [vmem:[%s877_s1 + $0xe8] sm:$0xff]  ;;  %s741_s21 = scalar_lea.vmem %s876_s0, %s593_s8  ;;  %s862_s17 = scalar_lea.vmem %s880_s4, %s593_s8 }
   0xe   : > { %400 = vmatpush.msra.mxu1 %v354_v3  ;;  %430 = vmatpush.msra.mxu2 %v369_v1  ;;  %v367_v9 = vld [vmem:[%s877_s1 + $0x160] sm:$0xff]  ;;  %v366_v12 = vld [vmem:[%s877_s1 + $0x158] sm:$0xff]  ;;  %v365_v15 = vld [vmem:[%s877_s1 + $0x150] sm:$0xff]  ;;  %s586_s26 = sshll.u32 %s887_s19, 1 }
   0xf   : > { %372 = vmatpush.msra.mxu0 %v337_v4  ;;  %596 = vmatpush.msra.mxu3 %v337_v4  ;;  %v335_v10 = vld [vmem:[%s877_s1 + $0x60] sm:$0xff]  ;;  %v334_v13 = vld [vmem:[%s877_s1 + $0x58] sm:$0xff]  ;;  %v333_v16 = vld [vmem:[%s877_s1 + $0x50] sm:$0xff]  ;;  %s243_s22 = scalar_lea.vmem %s881_s5, %s586_s26 }
  0x10   : > { %401 = vmatpush.msra.mxu1 %v353_v6  ;;  %431 = vmatpush.msra.mxu2 %v368_v5  ;;  %v351_v11 = vld [vmem:[%s877_s1 + $0xe0] sm:$0xff]  ;;  %v350_v14 = vld [vmem:[%s877_s1 + $0xd8] sm:$0xff]  ;;  %v349_v17 = vld [vmem:[%s877_s1 + $0xd0] sm:$0xff] }
  0x11   : > { %373 = vmatpush.msra.mxu0 %v336_v7  ;;  %597 = vmatpush.msra.mxu3 %v336_v7  ;;  %v364_v18 = vld [vmem:[%s877_s1 + $0x148] sm:$0xff]  ;;  %v363_v21 = vld [vmem:[%s877_s1 + $0x140] sm:$0xff]  ;;  %v362_v23 = vld [vmem:[%s877_s1 + $0x138] sm:$0xff] }
  0x12   : > { %402 = vmatpush.msra.mxu1 %v352_v8  ;;  %432 = vmatpush.msra.mxu2 %v367_v9  ;;  %v332_v19 = vld [vmem:[%s877_s1 + $0x48] sm:$0xff]  ;;  %v331_v22 = vld [vmem:[%s877_s1 + $0x40] sm:$0xff]  ;;  %v361_v25 = vld [vmem:[%s877_s1 + $0x130] sm:$0xff] }
  0x13   : > { %374 = vmatpush.msra.mxu0 %v335_v10  ;;  %598 = vmatpush.msra.mxu3 %v335_v10  ;;  %v348_v20 = vld [vmem:[%s877_s1 + $0xc8] sm:$0xff]  ;;  %v347_v24 = vld [vmem:[%s877_s1 + $0xc0] sm:$0xff]  ;;  %v330_v26 = vld [vmem:[%s877_s1 + $0x38] sm:$0xff] }
  0x14   : > { %403 = vmatpush.msra.mxu1 %v351_v11  ;;  %433 = vmatpush.msra.mxu2 %v366_v12  ;;  %v346_v27 = vld [vmem:[%s877_s1 + $0xb8] sm:$0xff]  ;;  %v244_v28 = vld [vmem:[%s741_s21] sm:$0xff]  ;;  %v245_v29 = vld [vmem:[%s741_s21 + $0x8] sm:$0xff] }
  0x15   : > { %375 = vmatpush.msra.mxu0 %v334_v13  ;;  %599 = vmatpush.msra.mxu3 %v334_v13  ;;  %v619_v30 = vld [vmem:[%s878_s2] ss:$0 sm:$0xff]  ;;  %v329_v31 = vld [vmem:[%s877_s1 + $0x30] sm:$0xff]  ;;  %v360_v33 = vld [vmem:[%s877_s1 + $0x128] sm:$0xff] }
  0x16   : > { %404 = vmatpush.msra.mxu1 %v350_v14  ;;  %434 = vmatpush.msra.mxu2 %v365_v15  ;;  %v620_v32 = vld [vmem:[%s879_s3] ss:$0 sm:$0xff]  ;;  %v345_v34 = vld [vmem:[%s877_s1 + $0xb0] sm:$0xff]  ;;  %v252_v35 = vmul.f32 %v619_v30, %v244_v28  ;;  %v253_v36 = vmul.f32 %v619_v30, %v245_v29  ;;  %v328_v37 = vld [vmem:[%s877_s1 + $0x28] sm:$0xff] }
  0x17   : > { %376 = vmatpush.msra.mxu0 %v333_v16  ;;  %600 = vmatpush.msra.mxu3 %v333_v16  ;;  %v246_v38 = vld [vmem:[%s741_s21 + $0x10] sm:$0xff]  ;;  %v247_v39 = vld [vmem:[%s741_s21 + $0x18] sm:$0xff]  ;;  %v344_v40 = vld [vmem:[%s877_s1 + $0xa8] sm:$0xff] }
  0x18   : > { %405 = vmatpush.msra.mxu1 %v349_v17  ;;  %435 = vmatpush.msra.mxu2 %v364_v18  ;;  %v260_v41 = vadd.f32 %v620_v32, %v252_v35  ;;  %v261_v42 = vadd.f32 %v620_v32, %v253_v36  ;;  %v359_v43 = vld [vmem:[%s877_s1 + $0x120] sm:$0xff]  ;;  %v254_v48 = vmul.f32 %v619_v30, %v246_v38  ;;  %v358_v50 = vld [vmem:[%s877_s1 + $0x118] sm:$0xff]  ;;  %v357_v55 = vld [vmem:[%s877_s1 + $0x110] sm:$0xff] }
  0x19   : > { %377 = vmatpush.msra.mxu0 %v332_v19  ;;  %601 = vmatpush.msra.mxu3 %v332_v19  ;;  %v327_v44 = vld [vmem:[%s877_s1 + $0x20] sm:$0xff]  ;;  %v255_v49 = vmul.f32 %v619_v30, %v247_v39  ;;  %v326_v51 = vld [vmem:[%s877_s1 + $0x18] sm:$0xff]  ;;  %v325_v56 = vld [vmem:[%s877_s1 + $0x10] sm:$0xff] }
  0x1a   : > { %406 = vmatpush.msra.mxu1 %v348_v20  ;;  %436 = vmatpush.msra.mxu2 %v363_v21  ;;  %v343_v45 = vld [vmem:[%s877_s1 + $0xa0] sm:$0xff]  ;;  %v264_v46 = vmax.f32 %v260_v41, 0.0  ;;  %v265_v47 = vmax.f32 %v261_v42, 0.0  ;;  %v342_v52 = vld [vmem:[%s877_s1 + $0x98] sm:$0xff]  ;;  %v341_v57 = vld [vmem:[%s877_s1 + $0x90] sm:$0xff]  ;;  %v262_v60 = vadd.f32 %v620_v32, %v254_v48 }
  0x1b   : > { %378 = vmatpush.msra.mxu0 %v331_v22  ;;  %602 = vmatpush.msra.mxu3 %v331_v22  ;;  %v263_v61 = vadd.f32 %v620_v32, %v255_v49  ;;  %v356_v62 = vld [vmem:[%s877_s1 + $0x108] sm:$0xff]  ;;  %v355_v5 = vld [vmem:[%s877_s1 + $0x100] sm:$0xff]  ;;  %vm838_vm3 = vmneg %vm272_vm0 }
  0x1c   : > { %407 = vmatpush.msra.mxu1 %v347_v24  ;;  %437 = vmatpush.msra.mxu2 %v362_v23  ;;  %v273_v53 = vrot.slane %v264_v46, 7  ;;  %v274_v54 = vrot.slane %v265_v47, 7  ;;  %v324_v1 = vld [vmem:[%s877_s1 + $0x8] sm:$0xff]  ;;  %v323_v6 = vld [vmem:[%s877_s1] sm:$0xff]  ;;  %v266_v12 = vmax.f32 %v262_v60, 0.0 }
  0x1d   : > { %379 = vmatpush.msra.mxu0 %v330_v26  ;;  %603 = vmatpush.msra.mxu3 %v330_v26  ;;  %v340_v4 = vld [vmem:[%s877_s1 + $0x88] sm:$0xff]  ;;  %v339_v8 = vld [vmem:[%s877_s1 + $0x80] sm:$0xff]  ;;  %v267_v13 = vmax.f32 %v263_v61, 0.0 }
  0x1e   : > { %408 = vmatpush.msra.mxu1 %v346_v27  ;;  %438 = vmatpush.msra.mxu2 %v361_v25  ;;  %v275_v58 = vsel %vm272_vm0, %v273_v53, %v274_v54  ;;  %v285_v59 = vsel %vm272_vm0, 0.0, %v273_v53  ;;  %v287_v11 = vsel %vm272_vm0, %v274_v54, 0.0  ;;  %v276_v16 = vrot.slane %v266_v12, 7 }
  0x1f   : > { %380 = vmatpush.msra.mxu0 %v329_v31  ;;  %604 = vmatpush.msra.mxu3 %v329_v31  ;;  %v309_v63 = vrot.slane %v285_v59, 2  ;;  %v310_v0 = vrot.slane %v275_v58, 2  ;;  %v294_v2 = vrot.slane %v285_v59, 1  ;;  %v295_v3 = vrot.slane %v275_v58, 1 }
  0x20   : > { %409 = vmatpush.msra.mxu1 %v345_v34  ;;  %439 = vmatpush.msra.mxu2 %v360_v33  ;;  %v312_v14 = vrot.slane %v287_v11, 2  ;;  %v297_v15 = vrot.slane %v287_v11, 1  ;;  %v277_v17 = vrot.slane %v267_v13, 7  ;;  %v286_v21 = vsel %vm272_vm0, 0.0, %v276_v16 }
  0x21   : > { %381 = vmatpush.msra.mxu0 %v328_v37  ;;  %605 = vmatpush.msra.mxu3 %v328_v37  ;;  %v311_v7 = vsel %vm308_vm1, %v309_v63, %v310_v0  ;;  %v296_v10 = vsel %vm293_vm2, %v294_v2, %v295_v3  ;;  %v314_v22 = vrot.slane %v286_v21, 2  ;;  %v299_v24 = vrot.slane %v286_v21, 1 }
  0x22   : > { %410 = vmatpush.msra.mxu1 %v344_v40  ;;  %440 = vmatpush.msra.mxu2 %v359_v43  ;;  %v313_v18 = vsel %vm308_vm1, %v310_v0, %v312_v14  ;;  %v298_v19 = vsel %vm293_vm2, %v295_v3, %v297_v15  ;;  %v278_v20 = vsel %vm272_vm0, %v276_v16, %v277_v17  ;;  %v288_v28 = vsel %vm272_vm0, %v277_v17, 0.0 }
  0x23   : > { %382 = vmatpush.msra.mxu0 %v327_v44  ;;  %606 = vmatpush.msra.mxu3 %v327_v44  ;;  %v315_v23 = vrot.slane %v278_v20, 2  ;;  %v300_v25 = vrot.slane %v278_v20, 1  ;;  %v317_v29 = vrot.slane %v288_v28, 2  ;;  %v302_v30 = vrot.slane %v288_v28, 1 }
  0x24   : > { %411 = vmatpush.msra.mxu1 %v343_v45  ;;  %441 = vmatpush.msra.mxu2 %v358_v50 }
  0x25   : > { %383 = vmatpush.msra.mxu0 %v326_v51  ;;  %607 = vmatpush.msra.mxu3 %v326_v51  ;;  %v316_v26 = vsel %vm308_vm1, %v314_v22, %v315_v23  ;;  %v301_v27 = vsel %vm293_vm2, %v299_v24, %v300_v25  ;;  %v318_v31 = vsel %vm308_vm1, %v315_v23, %v317_v29 }
  0x26   : > { %412 = vmatpush.msra.mxu1 %v342_v52  ;;  %442 = vmatpush.msra.mxu2 %v357_v55  ;;  %v303_v32 = vsel %vm293_vm2, %v300_v25, %v302_v30 }
  0x27   : > { %384 = vmatpush.msra.mxu0 %v325_v56  ;;  %608 = vmatpush.msra.mxu3 %v325_v56 }
  0x28   : > { %413 = vmatpush.msra.mxu1 %v341_v57  ;;  %443 = vmatpush.msra.mxu2 %v356_v62 }
  0x29   : > { %385 = vmatpush.msra.mxu0 %v324_v1  ;;  %609 = vmatpush.msra.mxu3 %v324_v1 }
  0x2a   : > { %414 = vmatpush.msra.mxu1 %v340_v4  ;;  %444 = vmatpush.msra.mxu2 %v355_v5 }
  0x2b   : > { %386 = vmatpush.msra.mxu0 %v323_v6  ;;  %445 = vmatmul.f32.vlgmr.msra.gmra.mxu2 %v311_v7 }
  0x2c   : > { %415 = vmatpush.msra.mxu1 %v339_v8  ;;  %588 = vmatmul.msk.f32.vlgmr.msra.gmra.mxu0 %vm838_vm3, %v273_v53 }
  0x2d   : > { %416 = vmatmul.f32.vlgmr.msra.gmra.mxu1 %v296_v10  ;;  %610 = vmatpush.msra.mxu3 %v323_v6 }
  0x2e   : > { %390 = vmatmul.f32.vlgmr.msra.gmra.mxu3 %v275_v58 }
  0x33   : > { %448 = vmatmul.f32.gmra.mxu2 %v313_v18 }
  0x35   : > { %419 = vmatmul.f32.gmra.mxu1 %v298_v19 }
  0x36   : > { %590 = vmatmul.msk.f32.gmra.mxu3 %vm838_vm3, %v276_v16 }
  0x3b   : > { %451 = vmatmul.f32.gmra.mxu2 %v316_v26 }
  0x3d   : > { %422 = vmatmul.f32.gmra.mxu1 %v301_v27 }
  0x3e   : > { %396 = vmatmul.f32.gmra.mxu3 %v278_v20 }
  0x43   : > { %454 = vmatmul.f32.gmra.mxu2 %v318_v31 }
  0x45   : > { %425 = vmatmul.f32.gmra.mxu1 %v303_v32 }
  0xa9   : > { %v388_v33 = vpop.f32.mrf.mxu0 }
  0xaa   : > { %v417_v34 = vpop.f32.mrf.mxu1 }
  0xab   : > { %v418_v35 = vadd.f32 %v417_v34, %v388_v33 }
  0xae   : > { %v446_v36 = vpop.f32.mrf.mxu2 }
  0xaf   : > { %v447_v37 = vadd.f32 %v446_v36, %v418_v35 }
  0xb1   : > { %482 = vst [vmem:[%s862_s17] sm:$0xff] %v447_v37  ;;  %v391_v38 = vpop.f32.mrf.mxu3  ;;  %v468_v52 = vmul.f32 %v447_v37, %v447_v37 }
  0xb2   : > { %v420_v39 = vpop.f32.mrf.mxu1 }
  0xb3   : > { %v421_v40 = vadd.f32 %v420_v39, %v391_v38 }
  0xb6   : > { %v449_v41 = vpop.f32.mrf.mxu2 }
  0xb7   : > { %v450_v42 = vadd.f32 %v449_v41, %v421_v40 }
  0xb9   : > { %483 = vst [vmem:[%s862_s17 + $0x8] sm:$0xff] %v450_v42  ;;  %v394_v43 = vpop.f32.mrf.mxu3  ;;  %v469_v50 = vmul.f32 %v450_v42, %v450_v42  ;;  %v458_v53 = vadd.f32 %v450_v42, %v447_v37 }
  0xba   : > { %v423_v44 = vpop.f32.mrf.mxu1 }
  0xbb   : > { %v424_v45 = vadd.f32 %v423_v44, %v394_v43  ;;  %v472_v56 = vadd.f32 %v469_v50, %v468_v52 }
  0xbe   : > { %v452_v46 = vpop.f32.mrf.mxu2 }
  0xbf   : > { %v453_v47 = vadd.f32 %v452_v46, %v424_v45 }
  0xc1   : > { %484 = vst [vmem:[%s862_s17 + $0x10] sm:$0xff] %v453_v47  ;;  %v397_v48 = vpop.f32.mrf.mxu3  ;;  %v470_v54 = vmul.f32 %v453_v47, %v453_v47  ;;  %v459_v57 = vadd.f32 %v458_v53, %v453_v47 }
  0xc2   : > { %v426_v49 = vpop.f32.mrf.mxu1 }
  0xc3   : > { %v427_v51 = vadd.f32 %v426_v49, %v397_v48  ;;  %v473_v59 = vadd.f32 %v472_v56, %v470_v54 }
  0xc6   : > { %v455_v55 = vpop.f32.mrf.mxu2 }
  0xc7   : > { %v456_v58 = vadd.f32 %v455_v55, %v427_v51 }
  0xc9   : > { %v460_v60 = vadd.f32 %v459_v57, %v456_v58  ;;  %v471_v61 = vmul.f32 %v456_v58, %v456_v58  ;;  %485 = vst [vmem:[%s862_s17 + $0x18] sm:$0xff] %v456_v58 }
  0xcb   : > { %v461_v62 = vrot.slane %v460_v60, 4  ;;  %v474_v63 = vadd.f32 %v473_v59, %v471_v61 }
  0xcd   : > { %v462_v0 = vadd.f32 %v461_v62, %v460_v60  ;;  %v475_v1 = vrot.slane %v474_v63, 4 }
  0xcf   : > { %v463_v2 = vrot.slane %v462_v0, 2  ;;  %v476_v3 = vadd.f32 %v475_v1, %v474_v63 }
  0xd1   : > { %v464_v4 = vadd.f32 %v463_v2, %v462_v0  ;;  %v477_v5 = vrot.slane %v476_v3, 2 }
  0xd3   : > { %v465_v6 = vrot.slane %v464_v4, 1  ;;  %v478_v7 = vadd.f32 %v477_v5, %v476_v3 }
  0xd5   : > { %v466_v8 = vadd.f32 %v465_v6, %v464_v4  ;;  %v479_v9 = vrot.slane %v478_v7, 1 }
  0xd7   : > { %467 = vst [vmem:[%s243_s22] sm:$0x1] %v466_v8  ;;  %v480_v10 = vadd.f32 %v479_v9, %v478_v7 }
  0xd9   : > { %481 = vst [vmem:[%s243_s22 + $0x1] sm:$0x1] %v480_v10 }
  0xda PF: > { %s16_s18 = sadd.s32 1, %s627_s18  }
  0xdb   : > { %p13_p5 = scmp.ge.s32.totalorder %s16_s18, 6  }
  0xdd   :  { %15 = sbr.rel (!%p13_p5) target bundleno = 1 (0x1), region = 78 }

</bundles_post_ra>
